<compile_context>
chip_gen: v5e
topology: v5e:2x2
jax: 0.10.0
libtpu: 0.0.40
codegen_flags: <defaults>
</compile_context>

<pallas_src>
from functools import partial

import jax
import jax.numpy as jnp
from jax import lax
from jax.experimental import pallas as pl
from jax.experimental.pallas import tpu as pltpu

_LANES = 128


def _iw_mse_kernel(pred_ref, targ_ref, imp_ref, out_ref, *, n_fc, tfc, batch, bc):
    """pred/targ block: (bc, tfc, 128); imp block: (tfc, 128); out block: (1, 128)."""
    i = pl.program_id(0)  # feature-row tile (parallel)
    b = pl.program_id(1)  # batch chunk (arbitrary / reduction)

    @pl.when(b == 0)
    def _init():
        out_ref[...] = jnp.zeros_like(out_ref)

    d = pred_ref[...].astype(jnp.float32) - targ_ref[...].astype(jnp.float32)

    # Mask the ragged tail of the batch axis (unspecified data in the out-of-bounds
    # region of the last block must be zeroed BEFORE squaring: NaN * 0 == NaN).
    if batch % bc:
        valid_b = jnp.minimum(batch - b * bc, bc)
        bidx = lax.broadcasted_iota(jnp.int32, d.shape, 0)
        d = jnp.where(bidx < valid_b, d, 0.0)

    per_feat = jnp.sum(d * d, axis=0)            # (tfc, 128), batch reduction
    contrib = per_feat * imp_ref[...]            # importance already f32

    # Mask the ragged tail of the feature-row axis.
    if n_fc % tfc:
        valid_r = jnp.minimum(n_fc - i * tfc, tfc)
        ridx = lax.broadcasted_iota(jnp.int32, contrib.shape, 0)
        contrib = jnp.where(ridx < valid_r, contrib, 0.0)

    out_ref[...] += jnp.sum(contrib, axis=0)[None, :]


def _choose_tiles(batch, n_fc, itemsize, target_block_bytes):
    """Pick (batch_chunk, feature_rows_per_block) for ~target_block_bytes blocks."""
    elems_budget = max(1, target_block_bytes // itemsize)

    if n_fc <= 8:
        # Feature axis already fits one (full-extent) tile; chunk the batch if huge.
        tfc = n_fc
        bc = int(max(1, min(batch, elems_budget // (tfc * _LANES))))
        return bc, tfc

    rows_budget = elems_budget // (batch * _LANES)
    if rows_budget >= 8:
        # Full batch per block; tile over feature rows (multiple of 8, ragged last
        # tile masked in-kernel -> no need to pad to a multiple of tfc*128).
        bc = batch
        tfc = n_fc if n_fc <= rows_budget else (rows_budget // 8) * 8
        return bc, tfc

    # Large batch: add a batch grid axis so blocks stay at the ~4 MiB sweet spot
    # with sublane-dense feature tiles and >= 8 KiB contiguous DMA runs.
    tfc = min(64, (n_fc // 8) * 8)
    bc = int(max(1, min(batch, elems_budget // (tfc * _LANES))))
    return bc, tfc


def importance_weighted_mse_batch(
    predictions,
    targets,
    importance,
    *,
    target_block_bytes=4 << 20,          # ~4 MiB pred/targ blocks (good v5e..v7x)
    vmem_limit_bytes=48 * 1024 * 1024,   # < v7x 64 MiB/TC, > v5e 16 MiB scoped default
):
    """predictions/targets: (B, ...); importance: (prod(rest),). Returns scalar f32."""
    assert predictions.shape == targets.shape
    B = predictions.shape[0]
    F = 1
    for s in predictions.shape[1:]:
        F *= s
    assert importance.size == F, "importance must match flattened feature size"

    pred2d = predictions.reshape(B, F)
    targ2d = targets.reshape(B, F)
    imp1d = importance.reshape(F).astype(jnp.float32)   # pre-cast once (micro-opt)

    n_fc = -(-F // _LANES)               # ceil(F / 128) feature "rows" of 128 lanes
    f_pad = n_fc * _LANES - F
    if f_pad:
        # Lane padding genuinely required: pad ONLY to the next multiple of 128.
        # Zero diff * zero importance contributes exactly 0.
        pred2d = jnp.pad(pred2d, ((0, 0), (0, f_pad)))
        targ2d = jnp.pad(targ2d, ((0, 0), (0, f_pad)))
        imp1d = jnp.pad(imp1d, (0, f_pad))

    # Contiguous row-major reshape: free (no HBM copy).
    pred3 = pred2d.reshape(B, n_fc, _LANES)
    targ3 = targ2d.reshape(B, n_fc, _LANES)
    imp2 = imp1d.reshape(n_fc, _LANES)

    itemsize = max(jnp.dtype(predictions.dtype).itemsize,
                   jnp.dtype(targets.dtype).itemsize)
    bc, tfc = _choose_tiles(B, n_fc, itemsize, target_block_bytes)

    n_feat_tiles = -(-n_fc // tfc)
    n_batch_tiles = -(-B // bc)

    kernel = partial(_iw_mse_kernel, n_fc=n_fc, tfc=tfc, batch=B, bc=bc)

    partials = pl.pallas_call(
        kernel,
        out_shape=jax.ShapeDtypeStruct((n_feat_tiles, _LANES), jnp.float32),
        grid_spec=pltpu.PrefetchScalarGridSpec(
            num_scalar_prefetch=0,
            grid=(n_feat_tiles, n_batch_tiles),
            in_specs=[
                pl.BlockSpec((bc, tfc, _LANES), lambda i, b: (b, i, 0)),
                pl.BlockSpec((bc, tfc, _LANES), lambda i, b: (b, i, 0)),
                pl.BlockSpec((tfc, _LANES), lambda i, b: (i, 0)),
            ],
            out_specs=pl.BlockSpec((1, _LANES), lambda i, b: (i, 0)),
        ),
        compiler_params=pltpu.CompilerParams(
            # Feature tiles are independent -> parallel (megacore on v7x);
            # batch chunks accumulate into the resident output block -> arbitrary.
            dimension_semantics=("parallel", "arbitrary"),
            vmem_limit_bytes=vmem_limit_bytes,
        ),
    )(pred3, targ3, imp2)

    # Tiny final reduction over (n_feat_tiles, 128) lane-dense partials.
    return jnp.sum(partials)


def _ref_loss(p, t, w):
    return jnp.sum(jnp.sum((p - t) ** 2, axis=0).reshape(-1) * w.reshape(-1))


if __name__ == "__main__":
    key = jax.random.PRNGKey(0)

    # --- main check: module-consistent small shapes (B=2, C=4, H=W=16) -----------
    kp, kt, ki, key = jax.random.split(key, 4)
    B, C, H, W = 2, 4, 16, 16
    F = C * H * W
    predictions = jax.random.normal(kp, (B, C, H, W), dtype=jnp.float32)
    targets = jax.random.normal(kt, (B, C, H, W), dtype=jnp.float32)
    importance = jax.random.uniform(ki, (F,), dtype=jnp.float32)

    loss = jax.block_until_ready(
        importance_weighted_mse_batch(predictions, targets, importance))
    ref = _ref_loss(predictions, targets, importance)
    assert jnp.allclose(loss, ref, rtol=1e-5, atol=1e-5), (loss, ref)

    # --- check 2: feature size not a multiple of 128 (minimal lane pad path) -----
    kp, kt, ki, key = jax.random.split(key, 4)
    p2 = jax.random.normal(kp, (3, 3, 5, 7), dtype=jnp.float32)
    t2 = jax.random.normal(kt, (3, 3, 5, 7), dtype=jnp.float32)
    w2 = jax.random.uniform(ki, (3 * 5 * 7,), dtype=jnp.float32)
    l2 = jax.block_until_ready(importance_weighted_mse_batch(p2, t2, w2))
    r2 = _ref_loss(p2, t2, w2)
    assert jnp.allclose(l2, r2, rtol=1e-5, atol=1e-5), (l2, r2)

    # --- check 3: force tiny blocks -> ragged feature tiles + batch chunking -----
    kp, kt, ki, key = jax.random.split(key, 4)
    p3 = jax.random.normal(kp, (5, 4, 16, 40), dtype=jnp.float32)   # F = 2560 -> n_fc = 20
    t3 = jax.random.normal(kt, (5, 4, 16, 40), dtype=jnp.float32)
    w3 = jax.random.uniform(ki, (4 * 16 * 40,), dtype=jnp.float32)
    l3 = jax.block_until_ready(
        importance_weighted_mse_batch(p3, t3, w3, target_block_bytes=16 * 1024))
    r3 = _ref_loss(p3, t3, w3)
    assert jnp.allclose(l3, r3, rtol=1e-5, atol=1e-5), (l3, r3)

    print("KERNEL_OK")
</pallas_src>

<mosaic_0001>
module attributes {stable_mosaic.version = 11 : i64} {
  func.func @_iw_mse_kernel(%arg0: i32, %arg1: i32, %arg2: memref<2x8x128xf32, #tpu.memory_space<vmem>>, %arg3: memref<2x8x128xf32, #tpu.memory_space<vmem>>, %arg4: memref<8x128xf32, #tpu.memory_space<vmem>>, %arg5: memref<1x128xf32, #tpu.memory_space<vmem>>) attributes {dimension_semantics = [#tpu.dimension_semantics<parallel>, #tpu.dimension_semantics<arbitrary>], iteration_bounds = array<i64: 1, 1>, scalar_prefetch = 0 : i64, scratch_operands = 0 : i64, tpu.core_type = #tpu.core_type<tc>, window_params = [{transform_indices = @transform_0, window_bounds = array<i64: 2, 8, 128>}, {transform_indices = @transform_1, window_bounds = array<i64: 2, 8, 128>}, {transform_indices = @transform_2, window_bounds = array<i64: 8, 128>}, {transform_indices = @transform_3, window_bounds = array<i64: 1, 128>}]} {
    %c0_i32 = arith.constant 0 : i32
    %0 = arith.cmpi eq, %arg1, %c0_i32 : i32
    %1 = arith.extui %0 : i1 to i32
    %c0_i32_0 = arith.constant 0 : i32
    %2 = arith.cmpi ne, %1, %c0_i32_0 : i32
    scf.if %2 {
      %cst_13 = arith.constant 0.000000e+00 : f32
      %15 = vector.broadcast %cst_13 : f32 to vector<1x128xf32>
      %c0_14 = arith.constant 0 : index
      %c0_15 = arith.constant 0 : index
      %16 = vector.load %arg5[%c0_14, %c0_15] : memref<1x128xf32, #tpu.memory_space<vmem>>, vector<1x128xf32>
      tpu.vector_store %arg5[%c0_14, %c0_15], %15 {strides = array<i32>} : memref<1x128xf32, #tpu.memory_space<vmem>>, vector<1x128xf32>,
    } else {
    }
    %c0 = arith.constant 0 : index
    %c0_1 = arith.constant 0 : index
    %c0_2 = arith.constant 0 : index
    %3 = vector.load %arg2[%c0, %c0_1, %c0_2] : memref<2x8x128xf32, #tpu.memory_space<vmem>>, vector<2x8x128xf32>
    %c0_3 = arith.constant 0 : index
    %c0_4 = arith.constant 0 : index
    %c0_5 = arith.constant 0 : index
    %4 = vector.load %arg3[%c0_3, %c0_4, %c0_5] : memref<2x8x128xf32, #tpu.memory_space<vmem>>, vector<2x8x128xf32>
    %5 = arith.subf %3, %4 : vector<2x8x128xf32>
    %6 = arith.mulf %5, %5 : vector<2x8x128xf32>
    %cst = arith.constant dense<0.000000e+00> : vector<8x128xf32>
    %7 = vector.multi_reduction <add>, %6, %cst [0] : vector<2x8x128xf32> to vector<8x128xf32>
    %c0_6 = arith.constant 0 : index
    %c0_7 = arith.constant 0 : index
    %8 = vector.load %arg4[%c0_6, %c0_7] : memref<8x128xf32, #tpu.memory_space<vmem>>, vector<8x128xf32>
    %9 = arith.mulf %7, %8 : vector<8x128xf32>
    %c0_8 = arith.constant 0 : index
    %c0_9 = arith.constant 0 : index
    %10 = vector.load %arg5[%c0_8, %c0_9] : memref<1x128xf32, #tpu.memory_space<vmem>>, vector<1x128xf32>
    %cst_10 = arith.constant dense<0.000000e+00> : vector<128xf32>
    %11 = vector.multi_reduction <add>, %9, %cst_10 [0] : vector<8x128xf32> to vector<128xf32>
    %12 = vector.shape_cast %11 : vector<128xf32> to vector<1x128xf32>
    %13 = arith.addf %10, %12 : vector<1x128xf32>
    %c0_11 = arith.constant 0 : index
    %c0_12 = arith.constant 0 : index
    %14 = vector.load %arg5[%c0_11, %c0_12] : memref<1x128xf32, #tpu.memory_space<vmem>>, vector<1x128xf32>
    tpu.vector_store %arg5[%c0_11, %c0_12], %13 {strides = array<i32>} : memref<1x128xf32, #tpu.memory_space<vmem>>, vector<1x128xf32>,
    return
  }
  func.func @transform_0(%arg0: i32, %arg1: i32) -> (i32, i32, i32) {
    %c0_i32 = arith.constant 0 : i32
    %c0_i32_0 = arith.constant 0 : i32
    return %arg1, %arg0, %c0_i32 : i32, i32, i32
  }
  func.func @transform_1(%arg0: i32, %arg1: i32) -> (i32, i32, i32) {
    %c0_i32 = arith.constant 0 : i32
    %c0_i32_0 = arith.constant 0 : i32
    return %arg1, %arg0, %c0_i32 : i32, i32, i32
  }
  func.func @transform_2(%arg0: i32, %arg1: i32) -> (i32, i32) {
    %c0_i32 = arith.constant 0 : i32
    %c0_i32_0 = arith.constant 0 : i32
    return %arg0, %c0_i32 : i32, i32
  }
  func.func @transform_3(%arg0: i32, %arg1: i32) -> (i32, i32) {
    %c0_i32 = arith.constant 0 : i32
    %c0_i32_0 = arith.constant 0 : i32
    return %arg0, %c0_i32 : i32, i32
  }
}

</mosaic_0001>

<bundles_post_ra>
// kernel: tpu_custom_call.1
= control target key start
LH: loop header
LB: loop body
LE: loop exit
PB: predicated region body
PF: predicated region fallthrough
CT: control target
= control target key end

     0   :  { %8 = vsyncpa [#allocation3], 0  ;;  %s251_s0 = inlined_call_operand.hbm [shape: f32[2,8,128], index: 0, kind: input, shape index: {}]   ;;  %s252_s1 = inlined_call_operand.hbm [shape: f32[2,8,128], index: 1, kind: input, shape index: {}]   ;;  %s253_s2 = inlined_call_operand.hbm [shape: f32[8,128], index: 2, kind: input, shape index: {}]   ;;  %s254_s3 = inlined_call_operand.hbm [shape: f32[1,128], index: 3, kind: output, shape index: {}]  }
   0x1   :  { %9 = vsyncpa [#allocation6], 0 }
   0x2   :  { %10 = vsyncpa [#allocation4], 0  ;;  %s28_s14 = sshll.u32 %s252_s1, 4  ;;  %s212_s15 = smov [#allocation5]   ;;  %s29_s14 = int_to_ptr.hbm [resolvable:$true] %s28_s14 }
   0x3   :  { %s30_s16 = sshll.u32 %s212_s15, 4  ;;  %s15_s19 = sshll.u32 %s251_s0, 4  ;;  %s31_s16 = int_to_ptr.vmem [resolvable:$true] %s30_s16  ;;  %s16_s19 = int_to_ptr.hbm [resolvable:$true] %s15_s19 }
   0x4   :  { %s213_s20 = smov 128   ;;  %s214_s21 = smov 8  }
   0x5   :  { %36 = dma.hbm_to_vmem [thread:$0]  %s29_s14, 256, %s31_s16, [#allocation6], %s213_s20, %s213_s20, %s214_s21  }
   0x6   :  { %s215_s22 = smov [#allocation2]   ;;  %s42_s26 = sshll.u32 %s253_s2, 4  ;;  %s43_s26 = int_to_ptr.hbm [resolvable:$true] %s42_s26 }
   0x7   :  { %s17_s23 = sshll.u32 %s215_s22, 4  ;;  %s216_s1 = smov [#allocation7]   ;;  %s18_s23 = int_to_ptr.vmem [resolvable:$true] %s17_s23 }
   0x8   :  { %23 = dma.hbm_to_vmem [thread:$0]  %s16_s19, 256, %s18_s23, [#allocation3], %s213_s20, %s213_s20, %s214_s21  }
   0x9   :  { %s44_s27 = sshll.u32 %s216_s1, 4  ;;  %s45_s27 = int_to_ptr.vmem [resolvable:$true] %s44_s27 }
   0xa   :  { %47 = dma.hbm_to_vmem [thread:$0]  %s43_s26, 128, %s45_s27, [#allocation6]  }
   0xb   :  { %206 = dma.done.wait [#allocation3], 256  }
   0xc   :  { %207 = vsyncadd [#allocation3], 4294967040 }
   0xd   :  { %208 = dma.done.wait [#allocation6], 384  }
   0xe   :  { %209 = vsyncadd [#allocation6], 4294966912  ;;  %v217_v0 = vmov 0.0   ;;  %v65_v1 = vld [vmem:[#allocation2] sm:$0xff]  ;;  %v66_v2 = vld [vmem:[#allocation2 + $0x8] sm:$0xff]  ;;  %s218_s0 = smov [#allocation8]  }
   0xf   :  { %64 = vst [vmem:[#allocation8] sm:$0x1] %v217_v0  ;;  %v67_v3 = vld [vmem:[#allocation5] sm:$0xff]  ;;  %v68_v4 = vld [vmem:[#allocation5 + $0x8] sm:$0xff]  ;;  %v74_v9 = vld [vmem:[#allocation7] sm:$0xff]  ;;  %s90_s2 = sshll.u32 %s218_s0, 4  ;;  %s91_s2 = int_to_ptr.vmem [resolvable:$true] %s90_s2 }
  0x10   :  { %v69_v5 = vsub.f32 %v65_v1, %v67_v3  ;;  %v70_v6 = vsub.f32 %v66_v2, %v68_v4  ;;  %s92_s30 = sshll.u32 %s254_s3, 4  ;;  %s93_s30 = int_to_ptr.hbm [resolvable:$true] %s92_s30 }
  0x12   :  { %v71_v7 = vmul.f32 %v69_v5, %v69_v5  ;;  %v72_v8 = vmul.f32 %v70_v6, %v70_v6 }
  0x14   :  { %v73_v10 = vadd.f32 %v72_v8, %v71_v7 }
  0x16   :  { %v75_v11 = vmul.f32 %v74_v9, %v73_v10  ;;  %v76_v17 = vld [vmem:[#allocation8] sm:$0x1] }
  0x18   :  { %v77_v12 = vrot.slane %v75_v11, 4 }
  0x1a   :  { %v78_v13 = vadd.f32 %v77_v12, %v75_v11 }
  0x1c   :  { %v79_v14 = vrot.slane %v78_v13, 2 }
  0x1e   :  { %v80_v15 = vadd.f32 %v79_v14, %v78_v13 }
  0x20   :  { %v81_v16 = vrot.slane %v80_v15, 1 }
  0x22   :  { %v82_v18 = vadd.f32 %v81_v16, %v80_v15 }
  0x24   :  { %v83_v19 = vadd.f32 %v82_v18, %v76_v17 }
  0x26   :  { %84 = vst [vmem:[#allocation8] sm:$0x1] %v83_v19 }
  0x27   :  { %95 = dma.vmem_to_hbm [thread:$0]  %s91_s2, 16, %s93_s30, [#allocation4]  }
  0x28   :  { %210 = dma.done.wait [#allocation4], 16  }
  0x29   :  { %211 = vsyncadd [#allocation4], 4294967280 }
  0x2a   :  { %100 = vsyncpa [#allocation3], 1 }
  0x2b   :  { %101 = vsyncpa [#allocation6], 1 }
  0x2c   :  { %102 = vsyncpa [#allocation4], 1 }

</bundles_post_ra>
